<compile_context>
chip_gen: v7x
topology: tpu7x:2x2x1
jax: 0.10.0
libtpu: 0.0.40
codegen_flags: <defaults>
</compile_context>

<pallas_src>
import functools

import jax
import jax.numpy as jnp
from jax.experimental import pallas as pl
from jax.experimental.pallas import tpu as pltpu


def _lstm_kernel(xbt_ref, wblk_ref, whh_ref, bias_ref, out_ref,
                 *, seq_len, batch, hidden):
    T, B, H = seq_len, batch, hidden
    G = 4 * H

    # ------------------------------------------------------------------
    # Prologue (no serial dependence): project ALL timesteps through the
    # block-diagonal input weights in one bf16 MXU pass and fold in the
    # fused, pre-scaled bias.  Result is lane-major (B, T*4H): the per-step
    # slice below is a plain lane slice (a whole lane tile when 4H == 128),
    # so no sublane shuffles land on the recurrence's dependency chain.
    # ------------------------------------------------------------------
    p_all = (jnp.dot(xbt_ref[...], wblk_ref[...],
                     preferred_element_type=jnp.float32)
             + bias_ref[...])                          # (B, T*4H) f32

    whh = whh_ref[...]                                 # (H, 4H) bf16, vreg-resident

    # Encode.init_hidden() -> zeros
    h = jnp.zeros((B, H), jnp.float32)
    c = jnp.zeros((B, H), jnp.float32)

    # Fully unrolled serial recurrence (T small and static).  Per step the
    # critical chain is: bf16 (B,H)x(H,4H) matmul, one tanh over the 4H gate
    # vector, a few VPU ops, and tanh(c).
    for t in range(T):
        if t == 0:
            gates = p_all[:, 0:G]                      # h == 0 -> skip hh matmul
        else:
            hh = jnp.dot(h.astype(jnp.bfloat16), whh,
                         preferred_element_type=jnp.float32)
            gates = p_all[:, t * G:(t + 1) * G] + hh   # (B, 4H)

        # i/f/o columns were pre-scaled by 0.5 on the host, so one tanh pass
        # over the whole 4H vector yields sigmoid via 0.5*t + 0.5 exactly.
        tg = jnp.tanh(gates)
        i_g = 0.5 * tg[:, 0 * H:1 * H] + 0.5
        f_g = 0.5 * tg[:, 1 * H:2 * H] + 0.5
        g_g = tg[:, 2 * H:3 * H]
        o_g = 0.5 * tg[:, 3 * H:4 * H] + 0.5

        c = f_g * c + i_g * g_g
        h = o_g * jnp.tanh(c)

        # vst slots are idle during the recurrence: store h_t immediately
        # into the lane-dense output slab (no end-of-loop concat, no long
        # live ranges as T grows).
        out_ref[:, t * H:(t + 1) * H] = h.astype(out_ref.dtype)

    # c_n rides in the same slab; h_n == last timestep, recovered outside.
    out_ref[:, T * H:(T + 1) * H] = c.astype(out_ref.dtype)


def encode_forward(x, w_ih, w_hh, b_ih, b_hh):
    """Pallas LSTM encoder forward.

    x    : (T, B, D)  float32
    w_ih : (4H, D), w_hh : (4H, H), b_ih/b_hh : (4H,)   (PyTorch layout)
    returns (lstm_out (T,B,H), (h_n (1,B,H), c_n (1,B,H)))
    """
    T, B, D = x.shape
    H = w_hh.shape[1]
    G = 4 * H
    if T < 1:
        raise ValueError("encode_forward requires seq_len >= 1")

    f32 = jnp.float32
    w_ih = jnp.asarray(w_ih, f32)
    w_hh = jnp.asarray(w_hh, f32)
    bias = jnp.asarray(b_ih, f32) + jnp.asarray(b_hh, f32)

    # Pre-scale i/f/o gate rows by 0.5 (exact, power of 2 -> exact in bf16)
    # so the kernel can use a single tanh pass: sigmoid(x) = 0.5*tanh(x/2)+0.5.
    gate_scale = jnp.concatenate(
        [jnp.full((H,), 0.5, f32), jnp.full((H,), 0.5, f32),
         jnp.ones((H,), f32), jnp.full((H,), 0.5, f32)])
    w_ih_s = w_ih * gate_scale[:, None]                     # (4H, D)
    w_hh_s = w_hh * gate_scale[:, None]                     # (4H, H)
    bias_s = bias * gate_scale                              # (4H,)

    # Block-diagonal input projection weight so the prologue matmul
    # (B, T*D) @ (T*D, T*4H) directly produces a lane-major (B, T*4H) slab.
    wih_t = w_ih_s.T                                        # (D, 4H)
    w_blk = jnp.kron(jnp.eye(T, dtype=f32), wih_t).astype(jnp.bfloat16)  # (T*D, T*4H)
    whh_t = w_hh_s.T.astype(jnp.bfloat16)                   # (H, 4H)
    bias_tiled = jnp.tile(bias_s.reshape(1, G), (1, T))     # (1, T*4H) f32

    # Host-side layout prep (free one-time transpose/reshape + bf16 cast).
    x_bt = (jnp.asarray(x, f32).transpose(1, 0, 2)
            .reshape(B, T * D).astype(jnp.bfloat16))        # (B, T*D)

    kernel = functools.partial(_lstm_kernel, seq_len=T, batch=B, hidden=H)

    slab = pl.pallas_call(
        kernel,
        out_shape=jax.ShapeDtypeStruct((B, (T + 1) * H), f32),
        grid=(1,),
        in_specs=[
            pl.BlockSpec((B, T * D), lambda i: (0, 0)),       # x, lane-major
            pl.BlockSpec((T * D, T * G), lambda i: (0, 0)),   # block-diag W_ih^T
            pl.BlockSpec((H, G), lambda i: (0, 0)),           # W_hh^T
            pl.BlockSpec((1, T * G), lambda i: (0, 0)),       # fused, tiled bias
        ],
        out_specs=pl.BlockSpec((B, (T + 1) * H), lambda i: (0, 0)),
        compiler_params=pltpu.CompilerParams(
            dimension_semantics=("arbitrary",),
        ),
    )(x_bt, w_blk, whh_t, bias_tiled)

    # Layout plumbing back to PyTorch conventions.
    lstm_out = slab[:, :T * H].reshape(B, T, H).transpose(1, 0, 2)  # (T, B, H)
    c_n = slab[:, T * H:]                                           # (B, H)
    h_n = lstm_out[-1]                                              # (B, H)
    return lstm_out, (h_n[None], c_n[None])


def _reference_lstm(x, w_ih, w_hh, b_ih, b_hh):
    """Pure-JAX f32 reference (lax.scan) for correctness checking."""
    T, B, D = x.shape
    H = w_hh.shape[1]
    bias = b_ih + b_hh

    def step(carry, x_t):
        h, c = carry
        gates = x_t @ w_ih.T + h @ w_hh.T + bias
        i = jax.nn.sigmoid(gates[:, 0 * H:1 * H])
        f = jax.nn.sigmoid(gates[:, 1 * H:2 * H])
        g = jnp.tanh(gates[:, 2 * H:3 * H])
        o = jax.nn.sigmoid(gates[:, 3 * H:4 * H])
        c_new = f * c + i * g
        h_new = o * jnp.tanh(c_new)
        return (h_new, c_new), h_new

    h0 = jnp.zeros((B, H), jnp.float32)
    c0 = jnp.zeros((B, H), jnp.float32)
    (h_n, c_n), outs = jax.lax.scan(step, (h0, c0), x)
    return outs, (h_n[None], c_n[None])


if __name__ == "__main__":
    # Encode(hidden_dim=32, input_dim=4, num_lstm_layers=1, batch_size=2)
    seq_len, batch_size, input_dim, hidden_dim = 8, 2, 4, 32

    key = jax.random.PRNGKey(0)
    k_x, k1, k2, k3, k4 = jax.random.split(key, 5)

    # deterministic "PyTorch-like" uniform(-1/sqrt(H), 1/sqrt(H)) init
    bound = 1.0 / jnp.sqrt(jnp.float32(hidden_dim))
    w_ih = jax.random.uniform(k1, (4 * hidden_dim, input_dim), jnp.float32, -bound, bound)
    w_hh = jax.random.uniform(k2, (4 * hidden_dim, hidden_dim), jnp.float32, -bound, bound)
    b_ih = jax.random.uniform(k3, (4 * hidden_dim,), jnp.float32, -bound, bound)
    b_hh = jax.random.uniform(k4, (4 * hidden_dim,), jnp.float32, -bound, bound)

    x = jax.random.normal(k_x, (seq_len, batch_size, input_dim), jnp.float32)

    lstm_out, (h_n, c_n) = encode_forward(x, w_ih, w_hh, b_ih, b_hh)
    jax.block_until_ready((lstm_out, h_n, c_n))

    ref_out, (ref_h, ref_c) = _reference_lstm(x, w_ih, w_hh, b_ih, b_hh)
    assert lstm_out.shape == (seq_len, batch_size, hidden_dim)
    assert h_n.shape == (1, batch_size, hidden_dim)
    assert c_n.shape == (1, batch_size, hidden_dim)
    # bf16 MXU operands (f32 accumulate) through an 8-step recurrence:
    # tolerance loosened vs. the pure-f32 reference, per the perf review.
    assert jnp.allclose(lstm_out, ref_out, atol=2e-2, rtol=2e-2)
    assert jnp.allclose(h_n, ref_h, atol=2e-2, rtol=2e-2)
    assert jnp.allclose(c_n, ref_c, atol=2e-2, rtol=2e-2)

    print("KERNEL_OK")
</pallas_src>

<mosaic_0001>
module attributes {stable_mosaic.version = 11 : i64} {
  func.func @_lstm_kernel(%arg0: i32, %arg1: memref<2x32xbf16, #tpu.memory_space<vmem>>, %arg2: memref<32x1024xbf16, #tpu.memory_space<vmem>>, %arg3: memref<32x128xbf16, #tpu.memory_space<vmem>>, %arg4: memref<1x1024xf32, #tpu.memory_space<vmem>>, %arg5: memref<2x288xf32, #tpu.memory_space<vmem>>) attributes {dimension_semantics = [#tpu.dimension_semantics<arbitrary>], iteration_bounds = array<i64: 1>, scalar_prefetch = 0 : i64, scratch_operands = 0 : i64, tpu.core_type = #tpu.core_type<tc>, window_params = [{pipeline_mode = #tpu.pipeline_mode<synchronous>, transform_indices = @transform_0, window_bounds = array<i64: 2, 32>}, {pipeline_mode = #tpu.pipeline_mode<synchronous>, transform_indices = @transform_1, window_bounds = array<i64: 32, 1024>}, {pipeline_mode = #tpu.pipeline_mode<synchronous>, transform_indices = @transform_2, window_bounds = array<i64: 32, 128>}, {pipeline_mode = #tpu.pipeline_mode<synchronous>, transform_indices = @transform_3, window_bounds = array<i64: 1, 1024>}, {pipeline_mode = #tpu.pipeline_mode<synchronous>, transform_indices = @transform_4, window_bounds = array<i64: 2, 288>}]} {
    %c0 = arith.constant 0 : index
    %c0_0 = arith.constant 0 : index
    %0 = vector.load %arg1[%c0, %c0_0] : memref<2x32xbf16, #tpu.memory_space<vmem>>, vector<2x32xbf16>
    %c0_1 = arith.constant 0 : index
    %c0_2 = arith.constant 0 : index
    %1 = vector.load %arg2[%c0_1, %c0_2] : memref<32x1024xbf16, #tpu.memory_space<vmem>>, vector<32x1024xbf16>
    %cst = arith.constant dense<0.000000e+00> : vector<2x1024xf32>
    %2 = tpu.matmul %0, %1, %cst {dimension_numbers = #tpu.dot_dimension_numbers<[1], [0], [0], [1], [0, 0, 1, 1], [], []>} : vector<2x32xbf16>, vector<32x1024xbf16>, vector<2x1024xf32> -> vector<2x1024xf32>
    %c0_3 = arith.constant 0 : index
    %c0_4 = arith.constant 0 : index
    %3 = vector.load %arg4[%c0_3, %c0_4] : memref<1x1024xf32, #tpu.memory_space<vmem>>, vector<1x1024xf32>
    %4 = vector.broadcast %3 : vector<1x1024xf32> to vector<2x1024xf32>
    %5 = arith.addf %2, %4 : vector<2x1024xf32>
    %c0_5 = arith.constant 0 : index
    %c0_6 = arith.constant 0 : index
    %6 = vector.load %arg3[%c0_5, %c0_6] : memref<32x128xbf16, #tpu.memory_space<vmem>>, vector<32x128xbf16>
    %cst_7 = arith.constant 0.000000e+00 : f32
    %7 = vector.broadcast %cst_7 : f32 to vector<2x32xf32>
    %8 = vector.extract_strided_slice %5 {offsets = [0, 0], sizes = [2, 128], strides = [1, 1]} : vector<2x1024xf32> to vector<2x128xf32>
    %9 = math.tanh %8 : vector<2x128xf32>
    %10 = vector.extract_strided_slice %9 {offsets = [0, 0], sizes = [2, 32], strides = [1, 1]} : vector<2x128xf32> to vector<2x32xf32>
    %cst_8 = arith.constant 5.000000e-01 : f32
    %11 = vector.broadcast %cst_8 : f32 to vector<2x32xf32>
    %12 = arith.mulf %11, %10 : vector<2x32xf32>
    %cst_9 = arith.constant 5.000000e-01 : f32
    %13 = vector.broadcast %cst_9 : f32 to vector<2x32xf32>
    %14 = arith.addf %12, %13 : vector<2x32xf32>
    %15 = vector.extract_strided_slice %9 {offsets = [0, 32], sizes = [2, 32], strides = [1, 1]} : vector<2x128xf32> to vector<2x32xf32>
    %cst_10 = arith.constant 5.000000e-01 : f32
    %16 = vector.broadcast %cst_10 : f32 to vector<2x32xf32>
    %17 = arith.mulf %16, %15 : vector<2x32xf32>
    %cst_11 = arith.constant 5.000000e-01 : f32
    %18 = vector.broadcast %cst_11 : f32 to vector<2x32xf32>
    %19 = arith.addf %17, %18 : vector<2x32xf32>
    %20 = vector.extract_strided_slice %9 {offsets = [0, 64], sizes = [2, 32], strides = [1, 1]} : vector<2x128xf32> to vector<2x32xf32>
    %21 = vector.extract_strided_slice %9 {offsets = [0, 96], sizes = [2, 32], strides = [1, 1]} : vector<2x128xf32> to vector<2x32xf32>
    %cst_12 = arith.constant 5.000000e-01 : f32
    %22 = vector.broadcast %cst_12 : f32 to vector<2x32xf32>
    %23 = arith.mulf %22, %21 : vector<2x32xf32>
    %cst_13 = arith.constant 5.000000e-01 : f32
    %24 = vector.broadcast %cst_13 : f32 to vector<2x32xf32>
    %25 = arith.addf %23, %24 : vector<2x32xf32>
    %26 = arith.mulf %19, %7 : vector<2x32xf32>
    %27 = arith.mulf %14, %20 : vector<2x32xf32>
    %28 = arith.addf %26, %27 : vector<2x32xf32>
    %29 = math.tanh %28 : vector<2x32xf32>
    %30 = arith.mulf %25, %29 : vector<2x32xf32>
    %c0_14 = arith.constant 0 : index
    %c0_15 = arith.constant 0 : index
    %31 = vector.load %arg5[%c0_14, %c0_15] : memref<2x288xf32, #tpu.memory_space<vmem>>, vector<2x32xf32>
    tpu.vector_store %arg5[%c0_14, %c0_15], %30 {strides = array<i32>} : memref<2x288xf32, #tpu.memory_space<vmem>>, vector<2x32xf32>,
    %32 = arith.truncf %30 : vector<2x32xf32> to vector<2x32xbf16>
    %cst_16 = arith.constant dense<0.000000e+00> : vector<2x128xf32>
    %33 = tpu.matmul %32, %6, %cst_16 {dimension_numbers = #tpu.dot_dimension_numbers<[1], [0], [0], [1], [0, 0, 1, 1], [], []>} : vector<2x32xbf16>, vector<32x128xbf16>, vector<2x128xf32> -> vector<2x128xf32>
    %34 = vector.extract_strided_slice %5 {offsets = [0, 128], sizes = [2, 128], strides = [1, 1]} : vector<2x1024xf32> to vector<2x128xf32>
    %35 = arith.addf %34, %33 : vector<2x128xf32>
    %36 = math.tanh %35 : vector<2x128xf32>
    %37 = vector.extract_strided_slice %36 {offsets = [0, 0], sizes = [2, 32], strides = [1, 1]} : vector<2x128xf32> to vector<2x32xf32>
    %cst_17 = arith.constant 5.000000e-01 : f32
    %38 = vector.broadcast %cst_17 : f32 to vector<2x32xf32>
    %39 = arith.mulf %38, %37 : vector<2x32xf32>
    %cst_18 = arith.constant 5.000000e-01 : f32
    %40 = vector.broadcast %cst_18 : f32 to vector<2x32xf32>
    %41 = arith.addf %39, %40 : vector<2x32xf32>
    %42 = vector.extract_strided_slice %36 {offsets = [0, 32], sizes = [2, 32], strides = [1, 1]} : vector<2x128xf32> to vector<2x32xf32>
    %cst_19 = arith.constant 5.000000e-01 : f32
    %43 = vector.broadcast %cst_19 : f32 to vector<2x32xf32>
    %44 = arith.mulf %43, %42 : vector<2x32xf32>
    %cst_20 = arith.constant 5.000000e-01 : f32
    %45 = vector.broadcast %cst_20 : f32 to vector<2x32xf32>
    %46 = arith.addf %44, %45 : vector<2x32xf32>
    %47 = vector.extract_strided_slice %36 {offsets = [0, 64], sizes = [2, 32], strides = [1, 1]} : vector<2x128xf32> to vector<2x32xf32>
    %48 = vector.extract_strided_slice %36 {offsets = [0, 96], sizes = [2, 32], strides = [1, 1]} : vector<2x128xf32> to vector<2x32xf32>
    %cst_21 = arith.constant 5.000000e-01 : f32
    %49 = vector.broadcast %cst_21 : f32 to vector<2x32xf32>
    %50 = arith.mulf %49, %48 : vector<2x32xf32>
    %cst_22 = arith.constant 5.000000e-01 : f32
    %51 = vector.broadcast %cst_22 : f32 to vector<2x32xf32>
    %52 = arith.addf %50, %51 : vector<2x32xf32>
    %53 = arith.mulf %46, %28 : vector<2x32xf32>
    %54 = arith.mulf %41, %47 : vector<2x32xf32>
    %55 = arith.addf %53, %54 : vector<2x32xf32>
    %56 = math.tanh %55 : vector<2x32xf32>
    %57 = arith.mulf %52, %56 : vector<2x32xf32>
    %c0_23 = arith.constant 0 : index
    %c32 = arith.constant 32 : index
    %58 = vector.load %arg5[%c0_23, %c32] : memref<2x288xf32, #tpu.memory_space<vmem>>, vector<2x32xf32>
    tpu.vector_store %arg5[%c0_23, %c32], %57 {strides = array<i32>} : memref<2x288xf32, #tpu.memory_space<vmem>>, vector<2x32xf32>,
    %59 = arith.truncf %57 : vector<2x32xf32> to vector<2x32xbf16>
    %cst_24 = arith.constant dense<0.000000e+00> : vector<2x128xf32>
    %60 = tpu.matmul %59, %6, %cst_24 {dimension_numbers = #tpu.dot_dimension_numbers<[1], [0], [0], [1], [0, 0, 1, 1], [], []>} : vector<2x32xbf16>, vector<32x128xbf16>, vector<2x128xf32> -> vector<2x128xf32>
    %61 = vector.extract_strided_slice %5 {offsets = [0, 256], sizes = [2, 128], strides = [1, 1]} : vector<2x1024xf32> to vector<2x128xf32>
    %62 = arith.addf %61, %60 : vector<2x128xf32>
    %63 = math.tanh %62 : vector<2x128xf32>
    %64 = vector.extract_strided_slice %63 {offsets = [0, 0], sizes = [2, 32], strides = [1, 1]} : vector<2x128xf32> to vector<2x32xf32>
    %cst_25 = arith.constant 5.000000e-01 : f32
    %65 = vector.broadcast %cst_25 : f32 to vector<2x32xf32>
    %66 = arith.mulf %65, %64 : vector<2x32xf32>
    %cst_26 = arith.constant 5.000000e-01 : f32
    %67 = vector.broadcast %cst_26 : f32 to vector<2x32xf32>
    %68 = arith.addf %66, %67 : vector<2x32xf32>
    %69 = vector.extract_strided_slice %63 {offsets = [0, 32], sizes = [2, 32], strides = [1, 1]} : vector<2x128xf32> to vector<2x32xf32>
    %cst_27 = arith.constant 5.000000e-01 : f32
    %70 = vector.broadcast %cst_27 : f32 to vector<2x32xf32>
    %71 = arith.mulf %70, %69 : vector<2x32xf32>
    %cst_28 = arith.constant 5.000000e-01 : f32
    %72 = vector.broadcast %cst_28 : f32 to vector<2x32xf32>
    %73 = arith.addf %71, %72 : vector<2x32xf32>
    %74 = vector.extract_strided_slice %63 {offsets = [0, 64], sizes = [2, 32], strides = [1, 1]} : vector<2x128xf32> to vector<2x32xf32>
    %75 = vector.extract_strided_slice %63 {offsets = [0, 96], sizes = [2, 32], strides = [1, 1]} : vector<2x128xf32> to vector<2x32xf32>
    %cst_29 = arith.constant 5.000000e-01 : f32
    %76 = vector.broadcast %cst_29 : f32 to vector<2x32xf32>
    %77 = arith.mulf %76, %75 : vector<2x32xf32>
    %cst_30 = arith.constant 5.000000e-01 : f32
    %78 = vector.broadcast %cst_30 : f32 to vector<2x32xf32>
    %79 = arith.addf %77, %78 : vector<2x32xf32>
    %80 = arith.mulf %73, %55 : vector<2x32xf32>
    %81 = arith.mulf %68, %74 : vector<2x32xf32>
    %82 = arith.addf %80, %81 : vector<2x32xf32>
    %83 = math.tanh %82 : vector<2x32xf32>
    %84 = arith.mulf %79, %83 : vector<2x32xf32>
    %c0_31 = arith.constant 0 : index
    %c64 = arith.constant 64 : index
    %85 = vector.load %arg5[%c0_31, %c64] : memref<2x288xf32, #tpu.memory_space<vmem>>, vector<2x32xf32>
    tpu.vector_store %arg5[%c0_31, %c64], %84 {strides = array<i32>} : memref<2x288xf32, #tpu.memory_space<vmem>>, vector<2x32xf32>,
    %86 = arith.truncf %84 : vector<2x32xf32> to vector<2x32xbf16>
    %cst_32 = arith.constant dense<0.000000e+00> : vector<2x128xf32>
    %87 = tpu.matmul %86, %6, %cst_32 {dimension_numbers = #tpu.dot_dimension_numbers<[1], [0], [0], [1], [0, 0, 1, 1], [], []>} : vector<2x32xbf16>, vector<32x128xbf16>, vector<2x128xf32> -> vector<2x128xf32>
    %88 = vector.extract_strided_slice %5 {offsets = [0, 384], sizes = [2, 128], strides = [1, 1]} : vector<2x1024xf32> to vector<2x128xf32>
    %89 = arith.addf %88, %87 : vector<2x128xf32>
    %90 = math.tanh %89 : vector<2x128xf32>
    %91 = vector.extract_strided_slice %90 {offsets = [0, 0], sizes = [2, 32], strides = [1, 1]} : vector<2x128xf32> to vector<2x32xf32>
    %cst_33 = arith.constant 5.000000e-01 : f32
    %92 = vector.broadcast %cst_33 : f32 to vector<2x32xf32>
    %93 = arith.mulf %92, %91 : vector<2x32xf32>
    %cst_34 = arith.constant 5.000000e-01 : f32
    %94 = vector.broadcast %cst_34 : f32 to vector<2x32xf32>
    %95 = arith.addf %93, %94 : vector<2x32xf32>
    %96 = vector.extract_strided_slice %90 {offsets = [0, 32], sizes = [2, 32], strides = [1, 1]} : vector<2x128xf32> to vector<2x32xf32>
    %cst_35 = arith.constant 5.000000e-01 : f32
    %97 = vector.broadcast %cst_35 : f32 to vector<2x32xf32>
    %98 = arith.mulf %97, %96 : vector<2x32xf32>
    %cst_36 = arith.constant 5.000000e-01 : f32
    %99 = vector.broadcast %cst_36 : f32 to vector<2x32xf32>
    %100 = arith.addf %98, %99 : vector<2x32xf32>
    %101 = vector.extract_strided_slice %90 {offsets = [0, 64], sizes = [2, 32], strides = [1, 1]} : vector<2x128xf32> to vector<2x32xf32>
    %102 = vector.extract_strided_slice %90 {offsets = [0, 96], sizes = [2, 32], strides = [1, 1]} : vector<2x128xf32> to vector<2x32xf32>
    %cst_37 = arith.constant 5.000000e-01 : f32
    %103 = vector.broadcast %cst_37 : f32 to vector<2x32xf32>
    %104 = arith.mulf %103, %102 : vector<2x32xf32>
    %cst_38 = arith.constant 5.000000e-01 : f32
    %105 = vector.broadcast %cst_38 : f32 to vector<2x32xf32>
    %106 = arith.addf %104, %105 : vector<2x32xf32>
    %107 = arith.mulf %100, %82 : vector<2x32xf32>
    %108 = arith.mulf %95, %101 : vector<2x32xf32>
    %109 = arith.addf %107, %108 : vector<2x32xf32>
    %110 = math.tanh %109 : vector<2x32xf32>
    %111 = arith.mulf %106, %110 : vector<2x32xf32>
    %c0_39 = arith.constant 0 : index
    %c96 = arith.constant 96 : index
    %112 = vector.load %arg5[%c0_39, %c96] : memref<2x288xf32, #tpu.memory_space<vmem>>, vector<2x32xf32>
    tpu.vector_store %arg5[%c0_39, %c96], %111 {strides = array<i32>} : memref<2x288xf32, #tpu.memory_space<vmem>>, vector<2x32xf32>,
    %113 = arith.truncf %111 : vector<2x32xf32> to vector<2x32xbf16>
    %cst_40 = arith.constant dense<0.000000e+00> : vector<2x128xf32>
    %114 = tpu.matmul %113, %6, %cst_40 {dimension_numbers = #tpu.dot_dimension_numbers<[1], [0], [0], [1], [0, 0, 1, 1], [], []>} : vector<2x32xbf16>, vector<32x128xbf16>, vector<2x128xf32> -> vector<2x128xf32>
    %115 = vector.extract_strided_slice %5 {offsets = [0, 512], sizes = [2, 128], strides = [1, 1]} : vector<2x1024xf32> to vector<2x128xf32>
    %116 = arith.addf %115, %114 : vector<2x128xf32>
    %117 = math.tanh %116 : vector<2x128xf32>
    %118 = vector.extract_strided_slice %117 {offsets = [0, 0], sizes = [2, 32], strides = [1, 1]} : vector<2x128xf32> to vector<2x32xf32>
    %cst_41 = arith.constant 5.000000e-01 : f32
    %119 = vector.broadcast %cst_41 : f32 to vector<2x32xf32>
    %120 = arith.mulf %119, %118 : vector<2x32xf32>
    %cst_42 = arith.constant 5.000000e-01 : f32
    %121 = vector.broadcast %cst_42 : f32 to vector<2x32xf32>
    %122 = arith.addf %120, %121 : vector<2x32xf32>
    %123 = vector.extract_strided_slice %117 {offsets = [0, 32], sizes = [2, 32], strides = [1, 1]} : vector<2x128xf32> to vector<2x32xf32>
    %cst_43 = arith.constant 5.000000e-01 : f32
    %124 = vector.broadcast %cst_43 : f32 to vector<2x32xf32>
    %125 = arith.mulf %124, %123 : vector<2x32xf32>
    %cst_44 = arith.constant 5.000000e-01 : f32
    %126 = vector.broadcast %cst_44 : f32 to vector<2x32xf32>
    %127 = arith.addf %125, %126 : vector<2x32xf32>
    %128 = vector.extract_strided_slice %117 {offsets = [0, 64], sizes = [2, 32], strides = [1, 1]} : vector<2x128xf32> to vector<2x32xf32>
    %129 = vector.extract_strided_slice %117 {offsets = [0, 96], sizes = [2, 32], strides = [1, 1]} : vector<2x128xf32> to vector<2x32xf32>
    %cst_45 = arith.constant 5.000000e-01 : f32
    %130 = vector.broadcast %cst_45 : f32 to vector<2x32xf32>
    %131 = arith.mulf %130, %129 : vector<2x32xf32>
    %cst_46 = arith.constant 5.000000e-01 : f32
    %132 = vector.broadcast %cst_46 : f32 to vector<2x32xf32>
    %133 = arith.addf %131, %132 : vector<2x32xf32>
    %134 = arith.mulf %127, %109 : vector<2x32xf32>
    %135 = arith.mulf %122, %128 : vector<2x32xf32>
    %136 = arith.addf %134, %135 : vector<2x32xf32>
    %137 = math.tanh %136 : vector<2x32xf32>
    %138 = arith.mulf %133, %137 : vector<2x32xf32>
    %c0_47 = arith.constant 0 : index
    %c128 = arith.constant 128 : index
    %139 = vector.load %arg5[%c0_47, %c128] : memref<2x288xf32, #tpu.memory_space<vmem>>, vector<2x32xf32>
    tpu.vector_store %arg5[%c0_47, %c128], %138 {strides = array<i32>} : memref<2x288xf32, #tpu.memory_space<vmem>>, vector<2x32xf32>,
    %140 = arith.truncf %138 : vector<2x32xf32> to vector<2x32xbf16>
    %cst_48 = arith.constant dense<0.000000e+00> : vector<2x128xf32>
    %141 = tpu.matmul %140, %6, %cst_48 {dimension_numbers = #tpu.dot_dimension_numbers<[1], [0], [0], [1], [0, 0, 1, 1], [], []>} : vector<2x32xbf16>, vector<32x128xbf16>, vector<2x128xf32> -> vector<2x128xf32>
    %142 = vector.extract_strided_slice %5 {offsets = [0, 640], sizes = [2, 128], strides = [1, 1]} : vector<2x1024xf32> to vector<2x128xf32>
    %143 = arith.addf %142, %141 : vector<2x128xf32>
    %144 = math.tanh %143 : vector<2x128xf32>
    %145 = vector.extract_strided_slice %144 {offsets = [0, 0], sizes = [2, 32], strides = [1, 1]} : vector<2x128xf32> to vector<2x32xf32>
    %cst_49 = arith.constant 5.000000e-01 : f32
    %146 = vector.broadcast %cst_49 : f32 to vector<2x32xf32>
    %147 = arith.mulf %146, %145 : vector<2x32xf32>
    %cst_50 = arith.constant 5.000000e-01 : f32
    %148 = vector.broadcast %cst_50 : f32 to vector<2x32xf32>
    %149 = arith.addf %147, %148 : vector<2x32xf32>
    %150 = vector.extract_strided_slice %144 {offsets = [0, 32], sizes = [2, 32], strides = [1, 1]} : vector<2x128xf32> to vector<2x32xf32>
    %cst_51 = arith.constant 5.000000e-01 : f32
    %151 = vector.broadcast %cst_51 : f32 to vector<2x32xf32>
    %152 = arith.mulf %151, %150 : vector<2x32xf32>
    %cst_52 = arith.constant 5.000000e-01 : f32
    %153 = vector.broadcast %cst_52 : f32 to vector<2x32xf32>
    %154 = arith.addf %152, %153 : vector<2x32xf32>
    %155 = vector.extract_strided_slice %144 {offsets = [0, 64], sizes = [2, 32], strides = [1, 1]} : vector<2x128xf32> to vector<2x32xf32>
    %156 = vector.extract_strided_slice %144 {offsets = [0, 96], sizes = [2, 32], strides = [1, 1]} : vector<2x128xf32> to vector<2x32xf32>
    %cst_53 = arith.constant 5.000000e-01 : f32
    %157 = vector.broadcast %cst_53 : f32 to vector<2x32xf32>
    %158 = arith.mulf %157, %156 : vector<2x32xf32>
    %cst_54 = arith.constant 5.000000e-01 : f32
    %159 = vector.broadcast %cst_54 : f32 to vector<2x32xf32>
    %160 = arith.addf %158, %159 : vector<2x32xf32>
    %161 = arith.mulf %154, %136 : vector<2x32xf32>
    %162 = arith.mulf %149, %155 : vector<2x32xf32>
    %163 = arith.addf %161, %162 : vector<2x32xf32>
    %164 = math.tanh %163 : vector<2x32xf32>
    %165 = arith.mulf %160, %164 : vector<2x32xf32>
    %c0_55 = arith.constant 0 : index
    %c160 = arith.constant 160 : index
    %166 = vector.load %arg5[%c0_55, %c160] : memref<2x288xf32, #tpu.memory_space<vmem>>, vector<2x32xf32>
    tpu.vector_store %arg5[%c0_55, %c160], %165 {strides = array<i32>} : memref<2x288xf32, #tpu.memory_space<vmem>>, vector<2x32xf32>,
    %167 = arith.truncf %165 : vector<2x32xf32> to vector<2x32xbf16>
    %cst_56 = arith.constant dense<0.000000e+00> : vector<2x128xf32>
    %168 = tpu.matmul %167, %6, %cst_56 {dimension_numbers = #tpu.dot_dimension_numbers<[1], [0], [0], [1], [0, 0, 1, 1], [], []>} : vector<2x32xbf16>, vector<32x128xbf16>, vector<2x128xf32> -> vector<2x128xf32>
    %169 = vector.extract_strided_slice %5 {offsets = [0, 768], sizes = [2, 128], strides = [1, 1]} : vector<2x1024xf32> to vector<2x128xf32>
    %170 = arith.addf %169, %168 : vector<2x128xf32>
    %171 = math.tanh %170 : vector<2x128xf32>
    %172 = vector.extract_strided_slice %171 {offsets = [0, 0], sizes = [2, 32], strides = [1, 1]} : vector<2x128xf32> to vector<2x32xf32>
    %cst_57 = arith.constant 5.000000e-01 : f32
    %173 = vector.broadcast %cst_57 : f32 to vector<2x32xf32>
    %174 = arith.mulf %173, %172 : vector<2x32xf32>
    %cst_58 = arith.constant 5.000000e-01 : f32
    %175 = vector.broadcast %cst_58 : f32 to vector<2x32xf32>
    %176 = arith.addf %174, %175 : vector<2x32xf32>
    %177 = vector.extract_strided_slice %171 {offsets = [0, 32], sizes = [2, 32], strides = [1, 1]} : vector<2x128xf32> to vector<2x32xf32>
    %cst_59 = arith.constant 5.000000e-01 : f32
    %178 = vector.broadcast %cst_59 : f32 to vector<2x32xf32>
    %179 = arith.mulf %178, %177 : vector<2x32xf32>
    %cst_60 = arith.constant 5.000000e-01 : f32
    %180 = vector.broadcast %cst_60 : f32 to vector<2x32xf32>
    %181 = arith.addf %179, %180 : vector<2x32xf32>
    %182 = vector.extract_strided_slice %171 {offsets = [0, 64], sizes = [2, 32], strides = [1, 1]} : vector<2x128xf32> to vector<2x32xf32>
    %183 = vector.extract_strided_slice %171 {offsets = [0, 96], sizes = [2, 32], strides = [1, 1]} : vector<2x128xf32> to vector<2x32xf32>
    %cst_61 = arith.constant 5.000000e-01 : f32
    %184 = vector.broadcast %cst_61 : f32 to vector<2x32xf32>
    %185 = arith.mulf %184, %183 : vector<2x32xf32>
    %cst_62 = arith.constant 5.000000e-01 : f32
    %186 = vector.broadcast %cst_62 : f32 to vector<2x32xf32>
    %187 = arith.addf %185, %186 : vector<2x32xf32>
    %188 = arith.mulf %181, %163 : vector<2x32xf32>
    %189 = arith.mulf %176, %182 : vector<2x32xf32>
    %190 = arith.addf %188, %189 : vector<2x32xf32>
    %191 = math.tanh %190 : vector<2x32xf32>
    %192 = arith.mulf %187, %191 : vector<2x32xf32>
    %c0_63 = arith.constant 0 : index
    %c192 = arith.constant 192 : index
    %193 = vector.load %arg5[%c0_63, %c192] : memref<2x288xf32, #tpu.memory_space<vmem>>, vector<2x32xf32>
    tpu.vector_store %arg5[%c0_63, %c192], %192 {strides = array<i32>} : memref<2x288xf32, #tpu.memory_space<vmem>>, vector<2x32xf32>,
    %194 = arith.truncf %192 : vector<2x32xf32> to vector<2x32xbf16>
    %cst_64 = arith.constant dense<0.000000e+00> : vector<2x128xf32>
    %195 = tpu.matmul %194, %6, %cst_64 {dimension_numbers = #tpu.dot_dimension_numbers<[1], [0], [0], [1], [0, 0, 1, 1], [], []>} : vector<2x32xbf16>, vector<32x128xbf16>, vector<2x128xf32> -> vector<2x128xf32>
    %196 = vector.extract_strided_slice %5 {offsets = [0, 896], sizes = [2, 128], strides = [1, 1]} : vector<2x1024xf32> to vector<2x128xf32>
    %197 = arith.addf %196, %195 : vector<2x128xf32>
    %198 = math.tanh %197 : vector<2x128xf32>
    %199 = vector.extract_strided_slice %198 {offsets = [0, 0], sizes = [2, 32], strides = [1, 1]} : vector<2x128xf32> to vector<2x32xf32>
    %cst_65 = arith.constant 5.000000e-01 : f32
    %200 = vector.broadcast %cst_65 : f32 to vector<2x32xf32>
    %201 = arith.mulf %200, %199 : vector<2x32xf32>
    %cst_66 = arith.constant 5.000000e-01 : f32
    %202 = vector.broadcast %cst_66 : f32 to vector<2x32xf32>
    %203 = arith.addf %201, %202 : vector<2x32xf32>
    %204 = vector.extract_strided_slice %198 {offsets = [0, 32], sizes = [2, 32], strides = [1, 1]} : vector<2x128xf32> to vector<2x32xf32>
    %cst_67 = arith.constant 5.000000e-01 : f32
    %205 = vector.broadcast %cst_67 : f32 to vector<2x32xf32>
    %206 = arith.mulf %205, %204 : vector<2x32xf32>
    %cst_68 = arith.constant 5.000000e-01 : f32
    %207 = vector.broadcast %cst_68 : f32 to vector<2x32xf32>
    %208 = arith.addf %206, %207 : vector<2x32xf32>
    %209 = vector.extract_strided_slice %198 {offsets = [0, 64], sizes = [2, 32], strides = [1, 1]} : vector<2x128xf32> to vector<2x32xf32>
    %210 = vector.extract_strided_slice %198 {offsets = [0, 96], sizes = [2, 32], strides = [1, 1]} : vector<2x128xf32> to vector<2x32xf32>
    %cst_69 = arith.constant 5.000000e-01 : f32
    %211 = vector.broadcast %cst_69 : f32 to vector<2x32xf32>
    %212 = arith.mulf %211, %210 : vector<2x32xf32>
    %cst_70 = arith.constant 5.000000e-01 : f32
    %213 = vector.broadcast %cst_70 : f32 to vector<2x32xf32>
    %214 = arith.addf %212, %213 : vector<2x32xf32>
    %215 = arith.mulf %208, %190 : vector<2x32xf32>
    %216 = arith.mulf %203, %209 : vector<2x32xf32>
    %217 = arith.addf %215, %216 : vector<2x32xf32>
    %218 = math.tanh %217 : vector<2x32xf32>
    %219 = arith.mulf %214, %218 : vector<2x32xf32>
    %c0_71 = arith.constant 0 : index
    %c224 = arith.constant 224 : index
    %220 = vector.load %arg5[%c0_71, %c224] : memref<2x288xf32, #tpu.memory_space<vmem>>, vector<2x32xf32>
    tpu.vector_store %arg5[%c0_71, %c224], %219 {strides = array<i32>} : memref<2x288xf32, #tpu.memory_space<vmem>>, vector<2x32xf32>,
    %c0_72 = arith.constant 0 : index
    %c256 = arith.constant 256 : index
    %221 = vector.load %arg5[%c0_72, %c256] : memref<2x288xf32, #tpu.memory_space<vmem>>, vector<2x32xf32>
    tpu.vector_store %arg5[%c0_72, %c256], %217 {strides = array<i32>} : memref<2x288xf32, #tpu.memory_space<vmem>>, vector<2x32xf32>,
    return
  }
  func.func @transform_0(%arg0: i32) -> (i32, i32) {
    %c0_i32 = arith.constant 0 : i32
    %c0_i32_0 = arith.constant 0 : i32
    %c0_i32_1 = arith.constant 0 : i32
    return %c0_i32, %c0_i32_0 : i32, i32
  }
  func.func @transform_1(%arg0: i32) -> (i32, i32) {
    %c0_i32 = arith.constant 0 : i32
    %c0_i32_0 = arith.constant 0 : i32
    %c0_i32_1 = arith.constant 0 : i32
    return %c0_i32, %c0_i32_0 : i32, i32
  }
  func.func @transform_2(%arg0: i32) -> (i32, i32) {
    %c0_i32 = arith.constant 0 : i32
    %c0_i32_0 = arith.constant 0 : i32
    %c0_i32_1 = arith.constant 0 : i32
    return %c0_i32, %c0_i32_0 : i32, i32
  }
  func.func @transform_3(%arg0: i32) -> (i32, i32) {
    %c0_i32 = arith.constant 0 : i32
    %c0_i32_0 = arith.constant 0 : i32
    %c0_i32_1 = arith.constant 0 : i32
    return %c0_i32, %c0_i32_0 : i32, i32
  }
  func.func @transform_4(%arg0: i32) -> (i32, i32) {
    %c0_i32 = arith.constant 0 : i32
    %c0_i32_0 = arith.constant 0 : i32
    %c0_i32_1 = arith.constant 0 : i32
    return %c0_i32, %c0_i32_0 : i32, i32
  }
}

</mosaic_0001>

<bundles_post_ra>
// kernel: tpu_custom_call.1
= control target key start
LH: loop header
LB: loop body
LE: loop exit
PB: predicated region body
PF: predicated region fallthrough
CT: control target
= control target key end

     0   :  { %9 = vsyncpa [#allocation3], 0  ;;  %s1500_s0 = inlined_call_operand.hbm [shape: bf16[2,32], index: 0, kind: input, shape index: {}]   ;;  %s1501_s1 = inlined_call_operand.hbm [shape: bf16[32,1024], index: 1, kind: input, shape index: {}]   ;;  %s1502_s2 = inlined_call_operand.hbm [shape: bf16[32,128], index: 2, kind: input, shape index: {}]   ;;  %s1503_s3 = inlined_call_operand.vmem [shape: f32[1,1024], index: 3, kind: input, shape index: {}]   ;;  %s1504_s4 = inlined_call_operand.hbm [shape: f32[2,288], index: 4, kind: output, shape index: {}]  }
   0x1   :  { %10 = vsyncpa [#allocation6], 0 }
   0x2   :  { %11 = vsyncpa [#allocation4], 0  ;;  %s1230_s15 = smov [#allocation5]   ;;  %s1136_s19 = scalar_lea.hbm %s1501_s1, 2048 }
   0x3   :  { %s27_s16 = sshll.u32 %s1230_s15, 4  ;;  %p1137_p0 = scmp.ne.s32.totalorder %s1501_s1, %s1136_s19  ;;  %s28_s16 = int_to_ptr.vmem [resolvable:$true] %s27_s16 }
   0x4   :  { %p1140_p1 = scmp.lt.u32.totalorder %s1136_s19, %s1501_s1 }
   0x6   :  { %p1142_p2 = pnand %p1140_p1, %p1137_p0 }
   0x8   :  { %1145 = shalt.err (!%p1142_p2)
}
   0x9   :  { %s1146_s24 = scalar_lea.vmem %s28_s16, 2048  ;;  %p1151_p4 = scmp.lt.s32.totalorder %s28_s16, %s28_s16 }
   0xa   :  { %p1147_p3 = scmp.ne.s32.totalorder %s28_s16, %s1146_s24  ;;  %p1152_p5 = scmp.lt.s32.totalorder %s1146_s24, %s1146_s24 }
   0xc   :  { %p1153_p6 = por %p1152_p5, %p1151_p4 }
   0xe   :  { %p1154_p7 = pnand %p1153_p6, %p1147_p3 }
  0x10   :  { %1157 = shalt.err (!%p1154_p7)
}
  0x11   :  { %s1231_s25 = smov 512   ;;  %s1232_s26 = smov 32  }
  0x12   :  { %33 = dma.hbm_to_vmem [thread:$0]  %s1501_s1, 2048, %s28_s16, [#allocation6], %s1231_s25, %s1231_s25, %s1232_s26  }
  0x13   :  { %s1233_s29 = smov [#allocation2]   ;;  %s1234_s5 = smov [#allocation7]  }
  0x14   :  { %s18_s30 = sshll.u32 %s1233_s29, 4  ;;  %s39_s6 = sshll.u32 %s1234_s5, 4  ;;  %s19_s30 = int_to_ptr.vmem [resolvable:$true] %s18_s30  ;;  %s40_s6 = int_to_ptr.vmem [resolvable:$true] %s39_s6 }
  0x15   :  { %s1158_s9 = scalar_lea.hbm %s1500_s0, 16 }
  0x16   :  { %p1159_p8 = scmp.ne.s32.totalorder %s1500_s0, %s1158_s9  ;;  %p1162_p9 = scmp.lt.u32.totalorder %s1158_s9, %s1500_s0 }
  0x18   :  { %p1164_p10 = pnand %p1162_p9, %p1159_p8 }
  0x1a   :  { %1167 = shalt.err (!%p1164_p10)
}
  0x1b   :  { %s1168_s1 = scalar_lea.vmem %s19_s30, 16  ;;  %s1172_s14 = scalar_lea.vmem %s19_s30, 32 }
  0x1c   :  { %p1169_p11 = scmp.ne.s32.totalorder %s19_s30, %s1168_s1  ;;  %p1173_p12 = scmp.lt.s32.totalorder %s19_s30, %s19_s30 }
  0x1d   :  { %p1174_p13 = scmp.lt.s32.totalorder %s1172_s14, %s1168_s1 }
  0x1f   :  { %p1175_p0 = por %p1174_p13, %p1173_p12 }
  0x21   :  { %p1176_p1 = pnand %p1175_p0, %p1169_p11 }
  0x23   :  { %1179 = shalt.err (!%p1176_p1)
}
  0x24   :  { %21 = dma.hbm_to_vmem [thread:$0]  %s1500_s0, 16, %s19_s30, [#allocation3]  }
  0x25   :  { %s1180_s19 = scalar_lea.hbm %s1502_s2, 256 }
  0x26   :  { %p1181_p2 = scmp.ne.s32.totalorder %s1502_s2, %s1180_s19  ;;  %p1184_p3 = scmp.lt.u32.totalorder %s1180_s19, %s1502_s2 }
  0x28   :  { %p1186_p4 = pnand %p1184_p3, %p1181_p2 }
  0x2a   :  { %1189 = shalt.err (!%p1186_p4)
}
  0x2b   :  { %s1190_s24 = scalar_lea.vmem %s40_s6, 256  ;;  %p1195_p6 = scmp.lt.s32.totalorder %s40_s6, %s40_s6 }
  0x2c   :  { %p1191_p5 = scmp.ne.s32.totalorder %s40_s6, %s1190_s24  ;;  %p1196_p7 = scmp.lt.s32.totalorder %s1190_s24, %s1190_s24 }
  0x2e   :  { %p1197_p8 = por %p1196_p7, %p1195_p6 }
  0x30   :  { %p1198_p9 = pnand %p1197_p8, %p1191_p5 }
  0x32   :  { %1201 = shalt.err (!%p1198_p9)
}
  0x33   :  { %s1235_s0 = smov 64   ;;  %s1236_s25 = smov 4  }
  0x34   :  { %45 = dma.hbm_to_vmem [thread:$0]  %s1502_s2, 256, %s40_s6, [#allocation6], %s1235_s0, %s1235_s0, %s1236_s25  }
  0x35   :  { %1224 = dma.done.wait [#allocation3], 16  }
  0x36   :  { %1225 = vsyncadd [#allocation3], 4294967280 }
  0x37   :  { %1226 = dma.done.wait [#allocation6], 2304  }
  0x38   :  { %1227 = vsyncadd [#allocation6], 4294964992  ;;  %v1237_v0 = vmov 0   ;;  %v59_v1 = vld [vmem:[#allocation5] sm:$0xff]  ;;  %v1309_v9 = vld [vmem:[#allocation2] sm:$0x1]  ;;  %v77_v10 = vlaneseq }
  0x39   :  { %233 = vmatprep.mubr.bf16.mxu0 %v1237_v0  ;;  %274 = vmatprep.mubr.bf16.mxu1 %v1237_v0  ;;  %v63_v2 = vld [vmem:[#allocation5 + $0x20] sm:$0xff]  ;;  %vm197_vm0 = vcmask 261120   ;;  %v1320_v13 = vld [vmem:[%s1503_s3] sm:$0xff]  ;;  %v1238_v38 = vmov 0.0   ;;  %v1332_v39 = vld [vmem:[#allocation7 + $0x8] sm:$0xff]   ;;  %vm1239_vm1 = vmmov 0  }
  0x3a   :  { %v67_v3 = vld [vmem:[#allocation5 + $0x40] sm:$0xff]  ;;  %v984_v4 = vcombine.high %v59_v1, %v63_v2  ;;  %v983_v5 = vcombine.low %v59_v1, %v63_v2  ;;  %v1314_v11 = vshrl.u32 %v77_v10, 7  ;;  %v61_v28 = vld [vmem:[#allocation5 + $0x10] sm:$0xff]  ;;  %v60_v1 = vld [vmem:[#allocation5 + $0x8] sm:$0xff]  ;;  %vm400_vm2 = vcmask 254976   ;;  %s1241_s3 = smov 96  }
  0x3b   :  { %v71_v6 = vld [vmem:[#allocation5 + $0x60] sm:$0xff]  ;;  %v65_v29 = vld [vmem:[#allocation5 + $0x30] sm:$0xff]  ;;  %v64_v2 = vld [vmem:[#allocation5 + $0x28] sm:$0xff]  ;;  %vm493_vm3 = vcmask 517376   ;;  %vm574_vm4 = vcmask 779776   ;;  %vm644_vm5 = vcmask 1042176  }
  0x3c   :  { %v992_v7 = vcombine.high %v67_v3, %v71_v6  ;;  %201 = vmatprep.subr.bf16.mxu0 %v984_v4  ;;  %v991_v8 = vcombine.low %v67_v3, %v71_v6  ;;  %v79_v12 = vsub.s32 0, %v1314_v11  ;;  %v69_v30 = vld [vmem:[#allocation5 + $0x50] sm:$0xff]  ;;  %v987_v31 = vcombine.low %v61_v28, %v65_v29  ;;  %v1325_v37 = vld [vmem:[#allocation7] sm:$0xff]   ;;  %v68_v3 = vld [vmem:[#allocation5 + $0x48] sm:$0xff] }
  0x3d   :  { %202 = vmatpush1.bf16.msra.mxu0 %v983_v5  ;;  %v988_v32 = vcombine.high %v61_v28, %v65_v29  ;;  %v73_v33 = vld [vmem:[#allocation5 + $0x70] sm:$0xff]  ;;  %v83_v48 = vsub.s32 1, %v1314_v11  ;;  %v986_v4 = vcombine.high %v60_v1, %v64_v2  ;;  %v985_v5 = vcombine.low %v60_v1, %v64_v2  ;;  %v72_v6 = vld [vmem:[#allocation5 + $0x68] sm:$0xff]  ;;  %v66_v10 = vld [vmem:[#allocation5 + $0x38] sm:$0xff] }
  0x3e   :  { %203 = vmatprep.subr.bf16.mxu0 %v992_v7  ;;  %v80_v14 = vrot.slane %v1320_v13, %v79_v12  ;;  %v996_v34 = vcombine.high %v69_v30, %v73_v33  ;;  %v995_v35 = vcombine.low %v69_v30, %v73_v33  ;;  %v994_v7 = vcombine.high %v68_v3, %v72_v6 }
  0x3f   :  { %v84_v49 = vrot.slane %v1320_v13, %v83_v48  ;;  %242 = vmatprep.subr.bf16.mxu1 %v986_v4  ;;  %v993_v12 = vcombine.low %v68_v3, %v72_v6 }
  0x40   :  { %243 = vmatpush1.bf16.msra.mxu1 %v985_v5 }
  0x41   :  { %204 = vmatpush1.bf16.msra.mxu0 %v991_v8  ;;  %v62_v8 = vld [vmem:[#allocation5 + $0x18] sm:$0xff]  ;;  %244 = vmatprep.subr.bf16.mxu1 %v994_v7 }
  0x42   :  { %283 = vmatprep.subr.bf16.mxu0 %v988_v32 }
  0x44   :  { %999 = vmatmul.mubr.msk.bf16.vlgmr.msra.gmra.mrb[0].mxu0 %vm197_vm0, %v1309_v9  ;;  %245 = vmatpush1.bf16.msra.mxu1 %v993_v12 }
  0x45   :  { %315 = vmatprep.mubr.bf16.mxu0 %v1237_v0  ;;  %284 = vmatpush1.bf16.msra.mxu0 %v987_v31  ;;  %v87_v31 = vsub.s32 2, %v1314_v11 }
  0x46   :  { %285 = vmatprep.subr.bf16.mxu0 %v996_v34 }
  0x47   :  { %1000 = vmatmul.mubr.msk.bf16.vlgmr.msra.gmra.mrb[0].mxu1 %vm197_vm0, %v1309_v9  ;;  %v88_v32 = vrot.slane %v1320_v13, %v87_v31 }
  0x48   :  { %356 = vmatprep.mubr.bf16.mxu1 %v1237_v0 }
  0x49   :  { %286 = vmatpush1.bf16.msra.mxu0 %v995_v35 }
  0x4a   :  { %1033 = vmatprep.subr.bf16.mxu0 %v1238_v38 }
  0x4c   :  { %1001 = vmatmul.mubr.msk.bf16.vlgmr.msra.gmra.mrb[4].mxu0 %vm197_vm0, %v1309_v9 }
  0x4d   :  { %1034 = vmatpush3.bf16.msra.mxu0 %v1325_v37  ;;  %1037 = vmatprep.mubr.msk.bf16.mxu0 %vm1239_vm1, %v1238_v38 }
  0x4e   :  { %1035 = vmatprep.subr.bf16.mxu0 %v1238_v38 }
  0x51   :  { %1036 = vmatpush3.bf16.msra.mxu0 %v1332_v39 }
  0x52   :  { %1049 = vmatprep.subr.bf16.mxu0 %v1238_v38 }
 0x117   :  { %v235_v15 = vpop.f32.mrb[0].mxu0 }
 0x118   :  { %v236_v16 = vadd.f32 %v235_v15, %v80_v14  ;;  %v237_v17 = vpop.f32.mrb[1].mxu0  ;;  %v990_v14 = vcombine.high %v62_v8, %v66_v10  ;;  %v70_v15 = vld [vmem:[#allocation5 + $0x58] sm:$0xff] }
 0x119   :  { %v239_v18 = vpop.f32.mrb[2].mxu0  ;;  %v238_v50 = vadd.f32 %v237_v17, %v84_v49 }
 0x11a   :  { %1104 = vtanh.f32 %v236_v16  ;;  %v240_v19 = vpop.f32.mrb[3].mxu0  ;;  %v74_v16 = vld [vmem:[#allocation5 + $0x78] sm:$0xff]  ;;  %v989_v18 = vcombine.low %v62_v8, %v66_v10  ;;  %324 = vmatprep.subr.bf16.mxu1 %v990_v14 }
 0x11b   :  { %v998_v19 = vcombine.high %v70_v15, %v74_v16 }
 0x11c   :  { %325 = vmatpush1.bf16.msra.mxu1 %v989_v18 }
 0x11d   :  { %326 = vmatprep.subr.bf16.mxu1 %v998_v19  ;;  %v95_v19 = vsub.s32 4, %v1314_v11 }
 0x11f   :  { %v1344_v43 = vpop.f32.mrb[4].mxu0 }
 0x120   :  { %v1346_v44 = vpop.f32.mrb[5].mxu0 }
 0x121   :  { %v321_v45 = vpop.f32.mrb[6].mxu0 }
 0x122   :  { %v322_v46 = vpop.f32.mrb[7].mxu0 }
 0x124   :  { %v1105_v20 = vpop.eup %1104 }
 0x125   :  { %374 = vrot.lane.b32.xlu0 %v1105_v20, %s1235_s0  ;;  %v370_v21 = vmul.f32 0.5, %v1105_v20  ;;  %v997_v20 = vcombine.low %v70_v15, %v74_v16 }
 0x127   :  { %v371_v22 = vadd.f32 0.5, %v370_v21  ;;  %327 = vmatpush1.bf16.msra.mxu1 %v997_v20  ;;  %v96_v20 = vrot.slane %v1320_v13, %v95_v19 }
 0x128   :  { %1041 = vmatprep.subr.bf16.mxu1 %v1238_v38 }
 0x129   :  { %v372_v25 = vmul.f32 0.0, %v371_v22 }
 0x12a   :  { %1002 = vmatmul.mubr.msk.bf16.vlgmr.msra.gmra.mrb[4].mxu1 %vm197_vm0, %v1309_v9  ;;  %v276_v9 = vpop.f32.mrb[0].mxu1 }
 0x12b   :  { %1042 = vmatpush3.bf16.msra.mxu1 %v1325_v37  ;;  %1045 = vmatprep.mubr.msk.bf16.mxu1 %vm1239_vm1, %v1238_v38  ;;  %v277_v33 = vadd.f32 %v276_v9, %v88_v32 }
 0x12c   :  { %1043 = vmatprep.subr.bf16.mxu1 %v1238_v38 }
 0x12f   :  { %1044 = vmatpush3.bf16.msra.mxu1 %v1332_v39 }
 0x130   :  { %1057 = vmatprep.subr.bf16.mxu1 %v1238_v38 }
 0x197   :  { %v375_v23 = vpop.permute.xlu0 %374 }
 0x198   :  { %v377_v24 = vmul.f32 %v375_v23, %v371_v22  ;;  %v278_v23 = vpop.f32.mrb[1].mxu1 }
 0x19a   :  { %379 = vrot.lane.b32.xlu0 %v377_v24, %s1232_s26  ;;  %v280_v24 = vpop.f32.mrb[2].mxu1 }
 0x20c   :  { %v380_v26 = vpop.permute.xlu0 %379 }
 0x20d   :  { %v382_v27 = vadd.f32 %v380_v26, %v372_v25  ;;  %v281_v25 = vpop.f32.mrb[3].mxu1 }
 0x20e   :  { %v1380_v26 = vpop.f32.mrb[4].mxu1 }
 0x20f   :  { %1106 = vtanh.f32 %v382_v27 }
 0x219   :  { %v1107_v36 = vpop.eup %1106 }
 0x21a   :  { %385 = vrot.lane.b32.xlu1 %v1107_v36, %s1235_s0 }
 0x28c   :  { %v386_v40 = vpop.permute.xlu1 %385 }
 0x28d   :  { %v1339_v41 = vmul.f32 %v386_v40, %v371_v22 }
 0x28f   :  { %v402_v42 = vpack.c.bf16 %v1339_v41, %v1339_v41 }
 0x291   :  { %404 = vrot.lane.b32.xlu1 %v402_v42, %s1232_s26 }
 0x303   :  { %v405_v47 = vpop.permute.xlu1 %404 }
 0x304   :  { %1038 = vmatmul.mubr.msk.bf16.vlgmr.msra.gmra.mrb[8].mxu0 %vm197_vm0, %v405_v47 }
 0x305   :  { %1050 = vmatpush3.bf16.msra.mxu0 %v1325_v37  ;;  %1053 = vmatprep.mubr.msk.bf16.mxu0 %vm1239_vm1, %v1238_v38 }
 0x306   :  { %1051 = vmatprep.subr.bf16.mxu0 %v1238_v38 }
 0x309   :  { %1052 = vmatpush3.bf16.msra.mxu0 %v1332_v39 }
 0x30a   :  { %1065 = vmatprep.subr.bf16.mxu0 %v1238_v38 }
 0x3d7   :  { %v455_v51 = vpop.f32.mrb[8].mxu0 }
 0x3d8   :  { %v461_v52 = vadd.f32 %v455_v51, %v238_v50  ;;  %v1039_v53 = vpop.f32.mrb[9].mxu0 }
 0x3d9   :  { %v458_v54 = vpop.f32.mrb[10].mxu0 }
 0x3da   :  { %1108 = vtanh.f32 %v461_v52  ;;  %v1040_v55 = vpop.f32.mrb[11].mxu0 }
 0x3e4   :  { %v1109_v56 = vpop.eup %1108 }
 0x3e5   :  { %467 = vrot.lane.b32.xlu0 %v1109_v56, %s1235_s0  ;;  %v463_v57 = vmul.f32 0.5, %v1109_v56 }
 0x3e7   :  { %v464_v58 = vadd.f32 0.5, %v463_v57 }
 0x3e9   :  { %v465_v61 = vmul.f32 %v464_v58, %v382_v27  ;;  %v1382_v27 = vpop.f32.mrb[5].mxu1 }
 0x3ea   :  { %v362_v28 = vpop.f32.mrb[6].mxu1 }
 0x3eb   :  { %v363_v29 = vpop.f32.mrb[7].mxu1 }
 0x457   :  { %v468_v59 = vpop.permute.xlu0 %467 }
 0x458   :  { %v470_v60 = vmul.f32 %v468_v59, %v464_v58 }
 0x45a   :  { %472 = vrot.lane.b32.xlu1 %v470_v60, %s1232_s26 }
 0x4cc   :  { %v473_v62 = vpop.permute.xlu1 %472 }
 0x4cd   :  { %v1359_v63 = vadd.f32 %v473_v62, %v465_v61 }
 0x4cf   :  { %1110 = vtanh.f32 %v1359_v63 }
 0x4d9   :  { %v1111_v17 = vpop.eup %1110 }
 0x4da   :  { %478 = vrot.lane.b32.xlu0 %v1111_v17, %s1235_s0 }
 0x54c   :  { %v479_v21 = vpop.permute.xlu0 %478 }
 0x54d   :  { %v1375_v0 = vmul.f32 %v479_v21, %v464_v58  ;;  %v91_v58 = vsub.s32 3, %v1314_v11  ;;  %v318_v21 = vadd.f32 %v1344_v43, %v96_v20 }
 0x54f   :  { %v495_v22 = vpack.c.bf16 %v1375_v0, %v1375_v0  ;;  %v92_v59 = vrot.slane %v1320_v13, %v91_v58 }
 0x551   :  { %497 = vrot.lane.b32.xlu1 %v495_v22, %s1232_s26  ;;  %v279_v60 = vadd.f32 %v278_v23, %v92_v59 }
 0x5c3   :  { %v498_v30 = vpop.permute.xlu1 %497 }
 0x5c4   :  { %1046 = vmatmul.mubr.msk.bf16.vlgmr.msra.gmra.mrb[8].mxu1 %vm197_vm0, %v498_v30 }
 0x5c5   :  { %1058 = vmatpush3.bf16.msra.mxu1 %v1325_v37  ;;  %1061 = vmatprep.mubr.msk.bf16.mxu1 %vm1239_vm1, %v1238_v38 }
 0x5c6   :  { %1059 = vmatprep.subr.bf16.mxu1 %v1238_v38 }
 0x5c9   :  { %1060 = vmatpush3.bf16.msra.mxu1 %v1332_v39 }
 0x5ca   :  { %1073 = vmatprep.subr.bf16.mxu1 %v1238_v38 }
 0x697   :  { %v536_v34 = vpop.f32.mrb[8].mxu1 }
 0x698   :  { %v542_v35 = vadd.f32 %v536_v34, %v277_v33  ;;  %v1047_v36 = vpop.f32.mrb[9].mxu1 }
 0x699   :  { %v539_v40 = vpop.f32.mrb[10].mxu1 }
 0x69a   :  { %1112 = vtanh.f32 %v542_v35  ;;  %v1048_v42 = vpop.f32.mrb[11].mxu1 }
 0x6a4   :  { %v1113_v45 = vpop.eup %1112 }
 0x6a5   :  { %548 = vrot.lane.b32.xlu0 %v1113_v45, %s1235_s0  ;;  %v544_v46 = vmul.f32 0.5, %v1113_v45 }
 0x6a7   :  { %v545_v47 = vadd.f32 0.5, %v544_v46  ;;  %v99_v46 = vsub.s32 5, %v1314_v11 }
 0x6a9   :  { %v546_v50 = vmul.f32 %v545_v47, %v1359_v63 }
 0x717   :  { %v549_v48 = vpop.permute.xlu0 %548 }
 0x718   :  { %v551_v49 = vmul.f32 %v549_v48, %v545_v47 }
 0x71a   :  { %553 = vrot.lane.b32.xlu1 %v551_v49, %s1232_s26 }
 0x78c   :  { %v554_v51 = vpop.permute.xlu1 %553 }
 0x78d   :  { %v556_v52 = vadd.f32 %v554_v51, %v546_v50 }
 0x78f   :  { %1114 = vtanh.f32 %v556_v52 }
 0x799   :  { %v1115_v53 = vpop.eup %1114 }
 0x79a   :  { %559 = vrot.lane.b32.xlu0 %v1115_v53, %s1235_s0 }
 0x80c   :  { %v560_v54 = vpop.permute.xlu0 %559 }
 0x80d   :  { %v1397_v55 = vmul.f32 %v560_v54, %v545_v47  ;;  %v100_v47 = vrot.slane %v1320_v13, %v99_v46 }
 0x80f   :  { %v576_v56 = vpack.c.bf16 %v1397_v55, %v1397_v55  ;;  %v320_v48 = vadd.f32 %v1346_v44, %v100_v47 }
 0x811   :  { %578 = vrot.lane.b32.xlu1 %v576_v56, %s1232_s26 }
 0x883   :  { %v579_v57 = vpop.permute.xlu1 %578 }
 0x884   :  { %1054 = vmatmul.mubr.msk.bf16.vlgmr.msra.gmra.mrb[12].mxu0 %vm197_vm0, %v579_v57 }
 0x885   :  { %1066 = vmatpush3.bf16.msra.mxu0 %v1325_v37  ;;  %1069 = vmatprep.mubr.msk.bf16.mxu0 %vm1239_vm1, %v1238_v38 }
 0x886   :  { %1067 = vmatprep.subr.bf16.mxu0 %v1238_v38 }
 0x889   :  { %1068 = vmatpush3.bf16.msra.mxu0 %v1332_v39 }
 0x88a   :  { %1081 = vmatprep.subr.bf16.mxu0 %v1238_v38 }
 0x957   :  { %v617_v61 = vpop.f32.mrb[12].mxu0 }
 0x958   :  { %v623_v62 = vadd.f32 %v617_v61, %v279_v60  ;;  %v1055_v63 = vpop.f32.mrb[13].mxu0 }
 0x959   :  { %v620_v1 = vpop.f32.mrb[14].mxu0 }
 0x95a   :  { %1116 = vtanh.f32 %v623_v62  ;;  %v1056_v2 = vpop.f32.mrb[15].mxu0  ;;  %v103_v1 = vsub.s32 6, %v1314_v11 }
 0x95c   :  { %v104_v2 = vrot.slane %v1320_v13, %v103_v1 }
 0x964   :  { %v1117_v3 = vpop.eup %1116 }
 0x965   :  { %629 = vrot.lane.b32.xlu0 %v1117_v3, %s1235_s0  ;;  %v625_v4 = vmul.f32 0.5, %v1117_v3  ;;  %v359_v3 = vadd.f32 %v1380_v26, %v104_v2 }
 0x967   :  { %v626_v5 = vadd.f32 0.5, %v625_v4 }
 0x969   :  { %v627_v8 = vmul.f32 %v626_v5, %v556_v52 }
 0x9d7   :  { %v630_v6 = vpop.permute.xlu0 %629 }
 0x9d8   :  { %v632_v7 = vmul.f32 %v630_v6, %v626_v5 }
 0x9da   :  { %634 = vrot.lane.b32.xlu1 %v632_v7, %s1232_s26 }
 0xa4c   :  { %v635_v10 = vpop.permute.xlu1 %634 }
 0xa4d   :  { %v637_v12 = vadd.f32 %v635_v10, %v627_v8 }
 0xa4f   :  { %1118 = vtanh.f32 %v637_v12 }
 0xa59   :  { %v1119_v14 = vpop.eup %1118 }
 0xa5a   :  { %640 = vrot.lane.b32.xlu0 %v1119_v14, %s1235_s0 }
 0xacc   :  { %v641_v15 = vpop.permute.xlu0 %640 }
 0xacd   :  { %v1414_v16 = vmul.f32 %v641_v15, %v626_v5 }
 0xacf   :  { %v646_v17 = vpack.c.bf16 %v1414_v16, %v1414_v16 }
 0xad1   :  { %648 = vrot.lane.b32.xlu1 %v646_v17, %s1232_s26 }
 0xb43   :  { %v649_v18 = vpop.permute.xlu1 %648 }
 0xb44   :  { %1062 = vmatmul.mubr.msk.bf16.vlgmr.msra.gmra.mrb[12].mxu1 %vm197_vm0, %v649_v18 }
 0xb45   :  { %1074 = vmatpush3.bf16.msra.mxu1 %v1325_v37  ;;  %1077 = vmatprep.mubr.msk.bf16.mxu1 %vm1239_vm1, %v1238_v38 }
 0xb46   :  { %1075 = vmatprep.subr.bf16.mxu1 %v1238_v38 }
 0xb49   :  { %1076 = vmatpush3.bf16.msra.mxu1 %v1332_v39 }
 0xc17   :  { %v687_v22 = vpop.f32.mrb[12].mxu1 }
 0xc18   :  { %v693_v9 = vadd.f32 %v687_v22, %v318_v21  ;;  %v1063_v23 = vpop.f32.mrb[13].mxu1 }
 0xc19   :  { %v690_v24 = vpop.f32.mrb[14].mxu1 }
 0xc1a   :  { %1120 = vtanh.f32 %v693_v9  ;;  %v1064_v25 = vpop.f32.mrb[15].mxu1  ;;  %v107_v24 = vsub.s32 7, %v1314_v11 }
 0xc1c   :  { %v108_v25 = vrot.slane %v1320_v13, %v107_v24 }
 0xc24   :  { %v1121_v28 = vpop.eup %1120 }
 0xc25   :  { %699 = vrot.lane.b32.xlu0 %v1121_v28, %s1235_s0  ;;  %v695_v29 = vmul.f32 0.5, %v1121_v28  ;;  %v361_v28 = vadd.f32 %v1382_v27, %v108_v25 }
 0xc27   :  { %v696_v30 = vadd.f32 0.5, %v695_v29 }
 0xc29   :  { %v697_v33 = vmul.f32 %v696_v30, %v637_v12 }
 0xc97   :  { %v700_v31 = vpop.permute.xlu0 %699 }
 0xc98   :  { %v702_v32 = vmul.f32 %v700_v31, %v696_v30 }
 0xc9a   :  { %704 = vrot.lane.b32.xlu1 %v702_v32, %s1232_s26 }
 0xd0c   :  { %v705_v34 = vpop.permute.xlu1 %704 }
 0xd0d   :  { %v707_v35 = vadd.f32 %v705_v34, %v697_v33  ;;  %v1240_v34 = vmov 1983009808  }
 0xd0f   :  { %1122 = vtanh.f32 %v707_v35 }
 0xd19   :  { %v1123_v43 = vpop.eup %1122 }
 0xd1a   :  { %710 = vrot.lane.b32.xlu0 %v1123_v43, %s1235_s0 }
 0xd8c   :  { %v711_v36 = vpop.permute.xlu0 %710 }
 0xd8d   :  { %v1431_v40 = vmul.f32 %v711_v36, %v696_v30 }
 0xd8f   :  { %v726_v42 = vpack.c.bf16 %v1431_v40, %v1431_v40 }
 0xd91   :  { %728 = vrot.lane.b32.xlu1 %v726_v42, %s1232_s26 }
 0xe03   :  { %v729_v45 = vpop.permute.xlu1 %728 }
 0xe04   :  { %1070 = vmatmul.mubr.msk.bf16.vlgmr.msra.gmra.mrb[16].mxu0 %vm197_vm0, %v729_v45 }
 0xe05   :  { %1082 = vmatpush3.bf16.msra.mxu0 %v1325_v37  ;;  %1085 = vmatprep.mubr.msk.bf16.mxu0 %vm1239_vm1, %v1238_v38 }
 0xe06   :  { %1083 = vmatprep.subr.bf16.mxu0 %v1238_v38 }
 0xe09   :  { %1084 = vmatpush3.bf16.msra.mxu0 %v1332_v39 }
 0xed7   :  { %v767_v49 = vpop.f32.mrb[16].mxu0 }
 0xed8   :  { %v773_v50 = vadd.f32 %v767_v49, %v320_v48  ;;  %v1071_v51 = vpop.f32.mrb[17].mxu0 }
 0xed9   :  { %v770_v52 = vpop.f32.mrb[18].mxu0 }
 0xeda   :  { %1124 = vtanh.f32 %v773_v50  ;;  %v1072_v53 = vpop.f32.mrb[19].mxu0 }
 0xee4   :  { %v1125_v37 = vpop.eup %1124 }
 0xee5   :  { %779 = vrot.lane.b32.xlu0 %v1125_v37, %s1235_s0  ;;  %v775_v54 = vmul.f32 0.5, %v1125_v37 }
 0xee7   :  { %v776_v56 = vadd.f32 0.5, %v775_v54 }
 0xee9   :  { %v777_v39 = vmul.f32 %v776_v56, %v707_v35  ;;  %v391_v35 = vunpack.c.l.s4 %v1240_v34 }
 0xeeb   :  { %v392_v43 = vunpack.c.0.s8 %v391_v35 }
 0xeed   :  { %v395_v36 = vsub.s32 %v392_v43, %v1314_v11 }
 0xeef   :  { %v396_v45 = vrot.slane %v1339_v41, %v395_v36  ;;  %v489_v13 = vrot.slane %v1375_v0, %v395_v36  ;;  %v721_v11 = vrot.slane %v1431_v40, %v395_v36  ;;  %v570_v50 = vrot.slane %v1397_v55, %v395_v36 }
 0xf57   :  { %v780_v38 = vpop.permute.xlu0 %779 }
 0xf58   :  { %v782_v57 = vmul.f32 %v780_v38, %v776_v56 }
 0xf5a   :  { %784 = vrot.lane.b32.xlu1 %v782_v57, %s1232_s26 }
 0xfcc   :  { %v785_v58 = vpop.permute.xlu1 %784 }
 0xfcd   :  { %v787_v59 = vadd.f32 %v785_v58, %v777_v39 }
 0xfcf   :  { %1126 = vtanh.f32 %v787_v59 }
 0xfd9   :  { %v1127_v44 = vpop.eup %1126 }
 0xfda   :  { %790 = vrot.lane.b32.xlu0 %v1127_v44, %s1235_s0 }
0x104c   :  { %v791_v60 = vpop.permute.xlu0 %790 }
0x104d   :  { %v1448_v61 = vmul.f32 %v791_v60, %v776_v56 }
0x104f   :  { %v806_v62 = vpack.c.bf16 %v1448_v61, %v1448_v61  ;;  %v801_v0 = vrot.slane %v1448_v61, %v395_v36 }
0x1051   :  { %808 = vrot.lane.b32.xlu1 %v806_v62, %s1232_s26 }
0x10c3   :  { %v809_v63 = vpop.permute.xlu1 %808 }
0x10c4   :  { %1078 = vmatmul.mubr.msk.bf16.vlgmr.msra.gmra.mrb[16].mxu1 %vm197_vm0, %v809_v63 }
0x1197   :  { %v847_v4 = vpop.f32.mrb[16].mxu1 }
0x1198   :  { %v853_v5 = vadd.f32 %v847_v4, %v359_v3  ;;  %v1079_v6 = vpop.f32.mrb[17].mxu1 }
0x1199   :  { %v850_v7 = vpop.f32.mrb[18].mxu1 }
0x119a   :  { %1128 = vtanh.f32 %v853_v5  ;;  %v1080_v8 = vpop.f32.mrb[19].mxu1 }
0x11a4   :  { %v1129_v10 = vpop.eup %1128 }
0x11a5   :  { %859 = vrot.lane.b32.xlu0 %v1129_v10, %s1235_s0  ;;  %v855_v12 = vmul.f32 0.5, %v1129_v10 }
0x11a7   :  { %v856_v14 = vadd.f32 0.5, %v855_v12 }
0x11a9   :  { %v857_v18 = vmul.f32 %v856_v14, %v787_v59 }
0x1217   :  { %v860_v15 = vpop.permute.xlu0 %859 }
0x1218   :  { %v862_v17 = vmul.f32 %v860_v15, %v856_v14 }
0x121a   :  { %864 = vrot.lane.b32.xlu1 %v862_v17, %s1232_s26 }
0x128c   :  { %v865_v19 = vpop.permute.xlu1 %864 }
0x128d   :  { %v867_v20 = vadd.f32 %v865_v19, %v857_v18 }
0x128f   :  { %1130 = vtanh.f32 %v867_v20 }
0x1299   :  { %v1131_v26 = vpop.eup %1130 }
0x129a   :  { %870 = vrot.lane.b32.xlu0 %v1131_v26, %s1235_s0 }
0x130c   :  { %v871_v21 = vpop.permute.xlu0 %870 }
0x130d   :  { %v873_v22 = vmul.f32 %v871_v21, %v856_v14 }
0x130f   :  { %v886_v9 = vpack.c.bf16 %v873_v22, %v873_v22  ;;  %v881_v55 = vrot.slane %v873_v22, %v395_v36 }
0x1311   :  { %888 = vrot.lane.b32.xlu1 %v886_v9, %s1232_s26 }
0x1383   :  { %v889_v23 = vpop.permute.xlu1 %888 }
0x1384   :  { %1086 = vmatmul.mubr.msk.bf16.vlgmr.msra.gmra.mrb[20].mxu0 %vm197_vm0, %v889_v23 }
0x1457   :  { %v927_v29 = vpop.f32.mrb[20].mxu0 }
0x1458   :  { %v933_v30 = vadd.f32 %v927_v29, %v361_v28  ;;  %v1087_v31 = vpop.f32.mrb[21].mxu0 }
0x1459   :  { %v930_v32 = vpop.f32.mrb[22].mxu0 }
0x145a   :  { %1132 = vtanh.f32 %v933_v30  ;;  %v1088_v33 = vpop.f32.mrb[23].mxu0 }
0x1464   :  { %v1133_v42 = vpop.eup %1132 }
0x1465   :  { %939 = vrot.lane.b32.xlu0 %v1133_v42, %s1235_s0  ;;  %v935_v27 = vmul.f32 0.5, %v1133_v42 }
0x1467   :  { %v936_v46 = vadd.f32 0.5, %v935_v27 }
0x1469   :  { %397 = vrot.lane.b32.xlu0 %v396_v45, %s1232_s26  ;;  %v937_v51 = vmul.f32 %v936_v46, %v867_v20 }
0x146d   :  { %490 = vrot.lane.b32.xlu0 %v489_v13, %s1235_s0 }
0x14d7   :  { %v940_v47 = vpop.permute.xlu0 %939 }
0x14d8   :  { %v942_v48 = vmul.f32 %v940_v47, %v936_v46 }
0x14da   :  { %944 = vrot.lane.b32.xlu1 %v942_v48, %s1232_s26 }
0x14db   :  { %v398_v49 = vpop.permute.xlu0 %397 }
0x14dc   :  { %401 = vst.msk [vmem:[#allocation8] sm:$0x3] %vm400_vm2, %v398_v49 }
0x14de   :  { %722 = vrot.lane.b32.xlu1 %v721_v11, %s1232_s26  ;;  %s1242_s26 = smov [#allocation8]  }
0x14df   :  { %v491_v41 = vpop.permute.xlu0 %490  ;;  %s973_s30 = sshll.u32 %s1242_s26, 4  ;;  %s974_s30 = int_to_ptr.vmem [resolvable:$true] %s973_s30 }
0x14e0   :  { %494 = vst.msk [vmem:[#allocation8] sm:$0x3] %vm493_vm3, %v491_v41  ;;  %s1202_s5 = scalar_lea.vmem %s974_s30, 96  ;;  %p1207_p11 = scmp.lt.s32.totalorder %s974_s30, %s974_s30 }
0x14e1   :  { %p1203_p10 = scmp.ne.s32.totalorder %s974_s30, %s1202_s5  ;;  %p1208_p12 = scmp.lt.s32.totalorder %s1202_s5, %s1202_s5 }
0x14e2   :  { %802 = vrot.lane.b32.xlu1 %v801_v0, %s1235_s0 }
0x14e3   :  { %p1209_p13 = por %p1208_p12, %p1207_p11 }
0x14e5   :  { %p1210_p0 = pnand %p1209_p13, %p1203_p10 }
0x14e6   :  { %571 = vrot.lane.b32.xlu1 %v570_v50, %s1241_s3 }
0x154c   :  { %v945_v52 = vpop.permute.xlu1 %944 }
0x154d   :  { %v947_v53 = vadd.f32 %v945_v52, %v937_v51 }
0x154f   :  { %1134 = vtanh.f32 %v947_v53  ;;  %v962_v37 = vrot.slane %v947_v53, %v395_v36 }
0x1550   :  { %v723_v40 = vpop.permute.xlu1 %722 }
0x1551   :  { %725 = vst.msk [vmem:[#allocation8 + $0x2] sm:$0x3] %vm400_vm2, %v723_v40  ;;  %963 = vrot.lane.b32.xlu1 %v962_v37, %s1241_s3 }
0x1554   :  { %v803_v54 = vpop.permute.xlu1 %802 }
0x1555   :  { %805 = vst.msk [vmem:[#allocation8 + $0x2] sm:$0x3] %vm493_vm3, %v803_v54 }
0x1558   :  { %v572_v56 = vpop.permute.xlu1 %571 }
0x1559   :  { %v1135_v38 = vpop.eup %1134  ;;  %575 = vst.msk [vmem:[#allocation8] sm:$0x3] %vm574_vm4, %v572_v56 }
0x155a   :  { %950 = vrot.lane.b32.xlu0 %v1135_v38, %s1235_s0  ;;  %645 = vst.msk [vmem:[#allocation8] sm:$0x3] %vm644_vm5, %v1414_v16 }
0x155e   :  { %882 = vrot.lane.b32.xlu0 %v881_v55, %s1241_s3 }
0x15c3   :  { %v964_v57 = vpop.permute.xlu1 %963 }
0x15c4   :  { %966 = vst.msk [vmem:[#allocation8 + $0x4] sm:$0x3] %vm400_vm2, %v964_v57 }
0x15cc   :  { %v951_v39 = vpop.permute.xlu0 %950 }
0x15cd   :  { %v953_v58 = vmul.f32 %v951_v39, %v936_v46 }
0x15d0   :  { %v883_v59 = vpop.permute.xlu0 %882 }
0x15d1   :  { %885 = vst.msk [vmem:[#allocation8 + $0x2] sm:$0x3] %vm574_vm4, %v883_v59 }
0x15d2   :  { %954 = vst.msk [vmem:[#allocation8 + $0x2] sm:$0x3] %vm644_vm5, %v953_v58 }
0x15d3   :  { %1213 = shalt.err (!%p1210_p0)
}
0x15d4   :  { %s1214_s8 = scalar_lea.hbm %s1504_s4, 96 }
0x15d5   :  { %p1215_p1 = scmp.ne.s32.totalorder %s1504_s4, %s1214_s8  ;;  %p1218_p2 = scmp.lt.u32.totalorder %s1214_s8, %s1504_s4 }
0x15d7   :  { %p1220_p3 = pnand %p1218_p2, %p1215_p1 }
0x15d9   :  { %1223 = shalt.err (!%p1220_p3)
}
0x15da   :  { %976 = dma.vmem_to_hbm [thread:$0]  %s974_s30, 96, %s1504_s4, [#allocation4]  }
0x15db   :  { %1228 = dma.done.wait [#allocation4], 96  }
0x15dc   :  { %1229 = vsyncadd [#allocation4], 4294967200 }
0x15dd   :  { %980 = vsyncpa [#allocation3], 1 }
0x15de   :  { %981 = vsyncpa [#allocation6], 1 }
0x15df   :  { %982 = vsyncpa [#allocation4], 1 }

</bundles_post_ra>
